<compile_context>
chip_gen: v7x
topology: tpu7x:2x2x1
jax: 0.10.0
libtpu: 0.0.40
codegen_flags: <defaults>
</compile_context>

<pallas_src>
import jax
import jax.numpy as jnp
from jax.experimental import pallas as pl
from jax.experimental.pallas import tpu as pltpu


def _gain_kernel(ratio_ref, wav_ref, out_ref):
    # ratio_ref: (r_tile, 1) per-row scale in wav's dtype (VMEM)
    # wav_ref / out_ref: (r_tile, t_tile) tiles (VMEM)
    out_ref[...] = wav_ref[...] * ratio_ref[...]


def _round_up(x: int, m: int) -> int:
    return -(-x // m) * m


def random_gain_apply(wav: jax.Array, gain_db: jax.Array,
                      *, block_bytes: int = 6 * 1024 * 1024,
                      donate_wav: bool = False) -> jax.Array:
    """Apply per-sample gain (in dB) to a (B, C, T) waveform batch via Pallas."""
    B, C, T = wav.shape
    assert gain_db.shape == (B,)
    dtype = wav.dtype
    itemsize = jnp.dtype(dtype).itemsize
    R = B * C

    # Hoist dB -> linear ratio out of the kernel (only B distinct values).
    ratio = jnp.power(10.0, gain_db.astype(jnp.float32) / 20.0)       # (B,)
    ratio_rows = jnp.repeat(ratio, C).astype(dtype)                   # (B*C,) one scale/row
    ratio_col = ratio_rows.reshape(R, 1)

    wav2d = wav.reshape(R, T)

    # ---- tiling: lane/sublane-dense blocks of ~block_bytes, ragged grid (no padding) ----
    sublane = 8 * max(1, 4 // itemsize)          # 8 for f32, 16 for bf16, ...
    r_tile = min(_round_up(R, sublane), 512)     # initial row tile
    t_tile = max((block_bytes // (r_tile * itemsize)) // 128 * 128, 128)
    T_128 = _round_up(T, 128)
    if t_tile >= T_128:
        # T is short: clamp the time tile and re-grow the row tile to fill the byte budget.
        t_tile = T_128
        r_target = (block_bytes // (t_tile * itemsize)) // sublane * sublane
        r_tile = max(sublane, min(_round_up(R, sublane), max(r_target, sublane)))

    # Time axis first: it is the axis that usually has >1 grid step, which is what the
    # two TensorCores on v7x split; v5e/v6e are single-TC and unaffected.
    grid = (pl.cdiv(T, t_tile), pl.cdiv(R, r_tile))

    # Explicit VMEM budget: double-buffered (wav + out) blocks + tiny ratio column.
    blk_bytes = r_tile * t_tile * itemsize
    vmem_needed = 2 * (2 * blk_bytes + r_tile * itemsize)
    vmem_limit = int(min(max(32 * 1024 * 1024, int(vmem_needed * 1.25)),
                         48 * 1024 * 1024))      # headroom under v7x's 64 MiB physical

    out2d = pl.pallas_call(
        _gain_kernel,
        out_shape=jax.ShapeDtypeStruct((R, T), dtype),
        grid=grid,
        in_specs=[
            pl.BlockSpec((r_tile, 1), lambda t, r: (r, 0)),        # per-row ratio
            pl.BlockSpec((r_tile, t_tile), lambda t, r: (r, t)),   # waveform tile
        ],
        out_specs=pl.BlockSpec((r_tile, t_tile), lambda t, r: (r, t)),
        compiler_params=pltpu.CompilerParams(
            dimension_semantics=("parallel", "parallel"),
            vmem_limit_bytes=vmem_limit,
        ),
        # Alias wav2d -> out when the caller donates wav (shapes now match exactly).
        input_output_aliases=({1: 0} if donate_wav else {}),
    )(ratio_col, wav2d)

    return out2d.reshape(B, C, T)


def random_gain(wav: jax.Array, key: jax.Array, min_gain: float, max_gain: float) -> jax.Array:
    """Full RandomGain.forward: sample gain_db per batch element, then scale."""
    delta = max_gain - min_gain
    assert delta > 0, "Max. gain must be greater than min. gain"
    B = wav.shape[0]
    # torch.rand(size=(B,)) * delta + min_gain
    gain_db = jax.random.uniform(key, (B,), dtype=jnp.float32) * delta + min_gain
    return random_gain_apply(wav, gain_db)


if __name__ == "__main__":
    key = jax.random.PRNGKey(0)
    k_wav, k_gain = jax.random.split(key)

    # small (batch, channels, time) waveform batch; T deliberately not a multiple of 128
    # to exercise the ragged-grid (masked edge block) path.
    B, C, T = 2, 4, 300
    wav = jax.random.normal(k_wav, (B, C, T), dtype=jnp.float32)

    min_gain, max_gain = -6.0, 6.0
    out = random_gain(wav, k_gain, min_gain, max_gain)
    out = jax.block_until_ready(out)

    # reference check in plain JAX
    delta = max_gain - min_gain
    gain_db = jax.random.uniform(k_gain, (B,), dtype=jnp.float32) * delta + min_gain
    ratio = 10.0 ** (gain_db / 20.0)
    ref = wav * ratio[:, None, None]
    assert out.shape == wav.shape and out.dtype == wav.dtype
    assert jnp.allclose(out, ref, rtol=1e-5, atol=1e-5), "mismatch vs reference"

    print("KERNEL_OK")
</pallas_src>

<mosaic_0001>
module attributes {stable_mosaic.version = 11 : i64} {
  func.func @_gain_kernel(%arg0: i32, %arg1: i32, %arg2: memref<8x1xf32, #tpu.memory_space<vmem>>, %arg3: memref<8x384xf32, #tpu.memory_space<vmem>>, %arg4: memref<8x384xf32, #tpu.memory_space<vmem>>) attributes {dimension_semantics = [#tpu.dimension_semantics<parallel>, #tpu.dimension_semantics<parallel>], iteration_bounds = array<i64: 1, 1>, scalar_prefetch = 0 : i64, scratch_operands = 0 : i64, tpu.core_type = #tpu.core_type<tc>, window_params = [{transform_indices = @transform_0, window_bounds = array<i64: 8, 1>}, {transform_indices = @transform_1, window_bounds = array<i64: 8, 384>}, {transform_indices = @transform_2, window_bounds = array<i64: 8, 384>}]} {
    %c0 = arith.constant 0 : index
    %c0_0 = arith.constant 0 : index
    %0 = vector.load %arg3[%c0, %c0_0] : memref<8x384xf32, #tpu.memory_space<vmem>>, vector<8x384xf32>
    %c0_1 = arith.constant 0 : index
    %c0_2 = arith.constant 0 : index
    %1 = vector.load %arg2[%c0_1, %c0_2] : memref<8x1xf32, #tpu.memory_space<vmem>>, vector<8x1xf32>
    %2 = vector.broadcast %1 : vector<8x1xf32> to vector<8x384xf32>
    %3 = arith.mulf %0, %2 : vector<8x384xf32>
    %c0_3 = arith.constant 0 : index
    %c0_4 = arith.constant 0 : index
    %4 = vector.load %arg4[%c0_3, %c0_4] : memref<8x384xf32, #tpu.memory_space<vmem>>, vector<8x384xf32>
    tpu.vector_store %arg4[%c0_3, %c0_4], %3 {strides = array<i32>} : memref<8x384xf32, #tpu.memory_space<vmem>>, vector<8x384xf32>,
    return
  }
  func.func @transform_0(%arg0: i32, %arg1: i32) -> (i32, i32) {
    %c0_i32 = arith.constant 0 : i32
    %c0_i32_0 = arith.constant 0 : i32
    return %arg1, %c0_i32 : i32, i32
  }
  func.func @transform_1(%arg0: i32, %arg1: i32) -> (i32, i32) {
    %c0_i32 = arith.constant 0 : i32
    return %arg1, %arg0 : i32, i32
  }
  func.func @transform_2(%arg0: i32, %arg1: i32) -> (i32, i32) {
    %c0_i32 = arith.constant 0 : i32
    return %arg1, %arg0 : i32, i32
  }
}

</mosaic_0001>

<bundles_post_ra>
// kernel: tpu_custom_call.1
= control target key start
LH: loop header
LB: loop body
LE: loop exit
PB: predicated region body
PF: predicated region fallthrough
CT: control target
= control target key end

     0   :  { %7 = vsyncpa [#allocation3], 0  ;;  %s151_s0 = inlined_call_operand.vmem [shape: f32[8,1], index: 0, kind: input, shape index: {}]   ;;  %s152_s1 = inlined_call_operand.hbm [shape: f32[8,300], index: 1, kind: input, shape index: {}]   ;;  %s153_s2 = inlined_call_operand.hbm [shape: f32[8,300], index: 2, kind: output, shape index: {}]  }
   0x1   :  { %8 = vsyncpa [#allocation4], 0  ;;  %s106_s9 = smov [#allocation2]   ;;  %s58_s13 = scalar_lea.hbm %s152_s1, 384 }
   0x2   :  { %s17_s10 = sshll.u32 %s106_s9, 4  ;;  %p59_p0 = scmp.ne.s32.totalorder %s152_s1, %s58_s13  ;;  %s18_s10 = int_to_ptr.vmem [resolvable:$true] %s17_s10 }
   0x3   :  { %p62_p1 = scmp.lt.u32.totalorder %s58_s13, %s152_s1 }
   0x5   :  { %p64_p2 = pnand %p62_p1, %p59_p0 }
   0x7   :  { %67 = shalt.err (!%p64_p2)
}
   0x8   :  { %s68_s18 = scalar_lea.vmem %s18_s10, 384  ;;  %p73_p4 = scmp.lt.s32.totalorder %s18_s10, %s18_s10 }
   0x9   :  { %p69_p3 = scmp.ne.s32.totalorder %s18_s10, %s68_s18  ;;  %p74_p5 = scmp.lt.s32.totalorder %s68_s18, %s68_s18 }
   0xb   :  { %p75_p6 = por %p74_p5, %p73_p4 }
   0xd   :  { %p76_p7 = pnand %p75_p6, %p69_p3 }
   0xf   :  { %79 = shalt.err (!%p76_p7)
}
  0x10   :  { %20 = dma.hbm_to_vmem [thread:$0]  %s152_s1, 384, %s18_s10, [#allocation3]  }
  0x11   :  { %102 = dma.done.wait [#allocation3], 384  }
  0x12   :  { %103 = vsyncadd [#allocation3], 4294966912  ;;  %v107_v0 = vmov 0   ;;  %v27_v1 = vld [vmem:[%s151_s0] sm:$0xff]  ;;  %v25_v3 = vld [vmem:[#allocation2 + $0x8] sm:$0xff]  ;;  %s108_s23 = smov [#allocation5]  }
  0x13   :  { %57 = vset.pattern.permute.xlu0 %v107_v0  ;;  %v24_v2 = vld [vmem:[#allocation2] sm:$0xff]  ;;  %v26_v4 = vld [vmem:[#allocation2 + $0x10] sm:$0xff]  ;;  %s45_s24 = sshll.u32 %s108_s23, 4  ;;  %s46_s24 = int_to_ptr.vmem [resolvable:$true] %s45_s24 }
  0x14   :  { %30 = vperm.xlu0 %57, %v27_v1   ;;  %s80_s1 = scalar_lea.vmem %s46_s24, 384  ;;  %p85_p9 = scmp.lt.s32.totalorder %s46_s24, %s46_s24 }
  0x15   :  { %p81_p8 = scmp.ne.s32.totalorder %s46_s24, %s80_s1  ;;  %p86_p10 = scmp.lt.s32.totalorder %s80_s1, %s80_s1 }
  0x17   :  { %p87_p11 = por %p86_p10, %p85_p9 }
  0x19   :  { %p88_p12 = pnand %p87_p11, %p81_p8 }
  0x93   :  { %v31_v5 = vpop.permute.xlu0 %30 }
  0x94   :  { %v33_v6 = vmul.f32 %v31_v5, %v24_v2  ;;  %v34_v7 = vmul.f32 %v31_v5, %v25_v3  ;;  %v35_v8 = vmul.f32 %v31_v5, %v26_v4 }
  0x96   :  { %36 = vst [vmem:[#allocation5] sm:$0xff] %v33_v6  ;;  %37 = vst [vmem:[#allocation5 + $0x8] sm:$0xff] %v34_v7 }
  0x97   :  { %38 = vst [vmem:[#allocation5 + $0x10] sm:$0xff] %v35_v8 }
  0x98   :  { %91 = shalt.err (!%p88_p12)
}
  0x99   :  { %s92_s26 = scalar_lea.hbm %s153_s2, 384 }
  0x9a   :  { %p93_p13 = scmp.ne.s32.totalorder %s153_s2, %s92_s26  ;;  %p96_p0 = scmp.lt.u32.totalorder %s92_s26, %s153_s2 }
  0x9c   :  { %p98_p1 = pnand %p96_p0, %p93_p13 }
  0x9e   :  { %101 = shalt.err (!%p98_p1)
}
  0x9f   :  { %48 = dma.vmem_to_hbm [thread:$0]  %s46_s24, 384, %s153_s2, [#allocation4]  }
  0xa0   :  { %104 = dma.done.wait [#allocation4], 384  }
  0xa1   :  { %105 = vsyncadd [#allocation4], 4294966912 }
  0xa2   :  { %52 = vsyncpa [#allocation3], 1 }
  0xa3   :  { %53 = vsyncpa [#allocation4], 1 }

</bundles_post_ra>
